<compile_context>
chip_gen: v7x
topology: tpu7x:2x2x1
jax: 0.10.0
libtpu: 0.0.40
codegen_flags: <defaults>
</compile_context>

<pallas_src>
import functools

import jax
import jax.numpy as jnp
from jax import lax
from jax.experimental import pallas as pl
from jax.experimental.pallas import tpu as pltpu

_SUBLANE = 8  # f32 sublane granularity


# ----------------------------------------------------------------------------------
# One-time probe: pin pltpu.roll's lane-rotation convention (element i -> i+shift,
# i.e. jnp.roll-like, vs the reverse) so the static gate-alignment shifts are correct
# on every backend version.  Runs once, outside any jit trace.
# ----------------------------------------------------------------------------------
def probe_roll_like_jnp():
    iota = jnp.broadcast_to(jnp.arange(128, dtype=jnp.float32), (8, 128))

    def _k(x_ref, o_ref):
        o_ref[...] = pltpu.roll(x_ref[...], 1, 1)

    y = pl.pallas_call(
        _k,
        out_shape=jax.ShapeDtypeStruct((8, 128), jnp.float32),
        in_specs=[pl.BlockSpec(memory_space=pltpu.MemorySpace.VMEM)],
        out_specs=pl.BlockSpec(memory_space=pltpu.MemorySpace.VMEM),
    )(iota)
    v = float(y[0, 0])
    if v == 127.0:
        return True       # jnp.roll convention: out[i] = in[(i - shift) % N]
    if v == 1.0:
        return False      # reverse convention:  out[i] = in[(i + shift) % N]
    raise RuntimeError(f"unexpected pltpu.roll behaviour: lane0 = {v}")


def _chunk_shift(p, H, roll_like_jnp):
    """Static roll amount that brings gate chunk p (lanes [pH,(p+1)H)) to lanes [0,H)."""
    return ((4 - p) % 4) * H if roll_like_jnp else p * H


# ------------------------------ fused forward kernel ------------------------------
def _make_fused_kernel(num_layers, num_convs, roll_like_jnp):
    def kernel(*refs):
        it = iter(refs)
        x_ref = next(it)                                    # (Bp, T, 1) f32, feeds both branches
        lstm_w = [(next(it), next(it), next(it)) for _ in range(num_layers)]
        conv_w = [(next(it), next(it), next(it)) for _ in range(num_convs)]
        w_lstm_ref = next(it)                               # (4H, 2) bf16, rows >= H are zero
        w_conv_ref = next(it)                               # (Cf, 2) bf16
        fcb_ref = next(it)                                  # (1, 2)  f32
        o_ref = next(it)                                    # (Bp, 2) f32
        scratch = list(it)                                  # [] or [hs_ref, xg_ref]
        if num_layers > 1:
            hs_ref, xg_ref = scratch                        # (T,Bp,H) f32, (T,Bp,4H) f32
        else:
            hs_ref = xg_ref = None

        Bp, T, _ = x_ref.shape
        H4 = lstm_w[0][1].shape[0]                          # 4H (padded w_hh is square)
        H = H4 // 4
        # PyTorch gate order (i, f, g, o): i chunk 0, f chunk 1, g chunk 2, o chunk 3.
        s_f = _chunk_shift(1, H, roll_like_jnp)
        s_g = _chunk_shift(2, H, roll_like_jnp)             # == 2H, convention independent
        s_o = _chunk_shift(3, H, roll_like_jnp)

        # ---------------------------------- LSTM branch ----------------------------------
        h = None
        for layer in range(num_layers):
            wih_ref, whh_ref, b_ref = lstm_w[layer]
            whh = whh_ref[...]                              # (4H, 4H) bf16, hoisted out of T loop
            b = b_ref[...]                                  # (1, 4H) f32
            if layer == 0:
                wih_row = wih_ref[...]                      # (1, 4H) f32 (Din == 1 -> VPU broadcast)
            else:
                # Whole-sequence input projection as one MXU dot (off the serial path),
                # parked in VMEM scratch and indexed per step (bounds live ranges).
                xg_ref[...] = (
                    jnp.dot(hs_ref[...].astype(jnp.bfloat16), wih_ref[...],
                            preferred_element_type=jnp.float32)
                    + b.reshape(1, 1, H4))

            keep_seq = (layer + 1) < num_layers
            # c/h kept full 4H-wide: only lanes [0,H) are meaningful; garbage lanes stay
            # bounded (gates in (0,1), tanh in (-1,1)) and hit zero rows of padded w_hh.
            h = jnp.zeros((Bp, H4), jnp.float32)
            c = jnp.zeros((Bp, H4), jnp.float32)
            for t in range(T):                              # T static & small -> full unroll
                if layer == 0:
                    xg_t = x_ref[:, t, :] * wih_row + b     # (Bp,1)*(1,4H)+(1,4H) -> (Bp,4H)
                else:
                    xg_t = xg_ref[t]
                z = xg_t + jnp.dot(h.astype(jnp.bfloat16), whh,
                                   preferred_element_type=jnp.float32)
                sig = jax.nn.sigmoid(z)                     # full-vreg EUP push
                th = jnp.tanh(z)                            # full-vreg EUP push
                f_al = pltpu.roll(sig, s_f, 1)              # XLU: f -> lanes [0,H)
                g_al = pltpu.roll(th, s_g, 1)               # XLU: g -> lanes [0,H)
                o_al = pltpu.roll(sig, s_o, 1)              # XLU: o -> lanes [0,H)
                c = f_al * c + sig * g_al                   # i already at chunk 0 of sig
                h = o_al * jnp.tanh(c)
                if keep_seq:
                    hs_ref[t] = h[:, :H]
        # h == last-layer hidden state at the final timestep (valid in lanes [0,H)).

        # ---------------------------------- Conv branch ----------------------------------
        act = x_ref[...]                                    # (Bp, L, Cin=1) channels-last, f32
        for (w_ref, scale_ref, shift_ref) in conv_w:
            w = w_ref[...]                                  # (K*Cin, Cout) bf16
            cout = w.shape[1]
            cin = act.shape[2]
            k_taps = w.shape[0] // cin
            lout = act.shape[1] - k_taps + 1
            # im2col: one MXU dot per layer with a K*Cin contraction.
            slab = jnp.concatenate([act[:, k:k + lout, :] for k in range(k_taps)], axis=2)
            y = jnp.dot(slab.astype(jnp.bfloat16), w, preferred_element_type=jnp.float32)
            y = y * scale_ref[...].reshape(1, 1, cout) + shift_ref[...].reshape(1, 1, cout)
            act = jnp.maximum(y, 0.0)                       # ReLU (Dropout = identity at eval)

        pooled = jnp.mean(act, axis=1)                      # AdaptiveAvgPool1d(1) + flatten

        # ------------------------------------- Head --------------------------------------
        o_ref[...] = (
            jnp.dot(h.astype(jnp.bfloat16), w_lstm_ref[...],
                    preferred_element_type=jnp.float32)
            + jnp.dot(pooled.astype(jnp.bfloat16), w_conv_ref[...],
                      preferred_element_type=jnp.float32)
            + fcb_ref[...]
        )

    return kernel


# ------------------------------ one-time parameter prep ------------------------------
def prepare_params(params):
    """Hoisted out of the forward path: transposes, w_hh zero-padding, dtype casts, FC split."""
    H = params["lstm"][0][1].shape[1]
    lstm = []
    for layer, (w_ih, w_hh, b) in enumerate(params["lstm"]):
        whh_pad = jnp.zeros((4 * H, 4 * H), jnp.float32).at[:H].set(jnp.transpose(w_hh))
        if layer == 0:
            wih = jnp.transpose(w_ih).astype(jnp.float32)       # (1, 4H), VPU broadcast path
        else:
            wih = jnp.transpose(w_ih).astype(jnp.bfloat16)      # (H, 4H), MXU path
        lstm.append((wih, whh_pad.astype(jnp.bfloat16), b.astype(jnp.float32)))

    convs = []
    for (w, scale, shift) in params["convs"]:
        cout, cin, k = w.shape
        w_mat = jnp.transpose(w, (2, 1, 0)).reshape(k * cin, cout)   # rows ordered (k, cin)
        convs.append((w_mat.astype(jnp.bfloat16),
                      scale.astype(jnp.float32), shift.astype(jnp.float32)))

    fc_wt = jnp.transpose(params["fc_w"])                            # (H + Cf, 2)
    w_lstm_pad = jnp.zeros((4 * H, 2), jnp.float32).at[:H].set(fc_wt[:H])
    return dict(lstm=lstm, convs=convs,
                w_lstm=w_lstm_pad.astype(jnp.bfloat16),
                w_conv=fc_wt[H:].astype(jnp.bfloat16),
                fc_b=params["fc_b"].astype(jnp.float32))


# ------------------------------------ forward --------------------------------------
def lstm_fcn_forward(x, prepped, *, roll_like_jnp=True):
    # Mirror the PyTorch branch on x.shape[2] == lstm.input_size (== 1):
    #   x is (B, T, 1)  -> lstm_in = x,           conv_in(NCW) = x^T
    #   x is (B, 1, T)  -> lstm_in = x^T,         conv_in(NCW) = x
    # In both cases the batch-first feature-1 LSTM input equals the channels-last
    # conv input, so ONE (B, T, 1) array feeds both branches.
    if x.shape[2] == 1:
        x_btc = x
    else:
        x_btc = jnp.transpose(x, (0, 2, 1))
    x_btc = x_btc.astype(jnp.float32)

    B, T, _ = x_btc.shape
    Bp = -(-B // _SUBLANE) * _SUBLANE                       # pad batch to sublane granularity
    if Bp != B:
        x_btc = jnp.pad(x_btc, ((0, Bp - B), (0, 0), (0, 0)))

    num_layers = len(prepped["lstm"])
    num_convs = len(prepped["convs"])
    H = prepped["lstm"][0][1].shape[0] // 4                 # static, from padded w_hh shape

    inputs = [x_btc]
    for trip in prepped["lstm"]:
        inputs.extend(trip)
    for trip in prepped["convs"]:
        inputs.extend(trip)
    inputs.extend([prepped["w_lstm"], prepped["w_conv"], prepped["fc_b"]])

    scratch = []
    if num_layers > 1:                                      # hidden sequence + gate inputs in VMEM
        scratch = [pltpu.VMEM((T, Bp, H), jnp.float32),
                   pltpu.VMEM((T, Bp, 4 * H), jnp.float32)]

    out = pl.pallas_call(
        _make_fused_kernel(num_layers, num_convs, roll_like_jnp),
        out_shape=jax.ShapeDtypeStruct((Bp, 2), jnp.float32),
        in_specs=[pl.BlockSpec(memory_space=pltpu.MemorySpace.VMEM)] * len(inputs),
        out_specs=pl.BlockSpec(memory_space=pltpu.MemorySpace.VMEM),
        scratch_shapes=scratch,
    )(*inputs)
    return out[:B]


# --------------------------- pure-JAX reference (PyTorch semantics) ------------------
def reference_forward(x, params):
    if x.shape[2] == 1:
        lstm_in = x
        conv_in = jnp.transpose(x, (0, 2, 1))               # (B, C, L) NCW
    else:
        lstm_in = jnp.transpose(x, (0, 2, 1))
        conv_in = x

    h = lstm_in
    for (w_ih, w_hh, b) in params["lstm"]:
        B, T, _ = h.shape
        H = w_hh.shape[1]

        def step(carry, x_t):
            hh, cc = carry
            z = x_t @ w_ih.T + hh @ w_hh.T + b
            i = jax.nn.sigmoid(z[:, :H])
            f = jax.nn.sigmoid(z[:, H:2 * H])
            g = jnp.tanh(z[:, 2 * H:3 * H])
            o = jax.nn.sigmoid(z[:, 3 * H:])
            cc = f * cc + i * g
            hh = o * jnp.tanh(cc)
            return (hh, cc), hh

        init = (jnp.zeros((B, H), jnp.float32), jnp.zeros((B, H), jnp.float32))
        _, hs = lax.scan(step, init, jnp.transpose(h, (1, 0, 2)))
        h = jnp.transpose(hs, (1, 0, 2))
    lstm_last = h[:, -1, :]

    c = conv_in
    for (w, scale, shift) in params["convs"]:
        K = w.shape[2]
        Lout = c.shape[2] - K + 1
        acc = jnp.zeros((c.shape[0], w.shape[0], Lout), jnp.float32)
        for k in range(K):
            acc = acc + jnp.einsum("oc,bcl->bol", w[:, :, k], c[:, :, k:k + Lout])
        c = jnp.maximum(acc * scale.reshape(1, -1, 1) + shift.reshape(1, -1, 1), 0.0)
    pooled = jnp.mean(c, axis=2)

    combined = jnp.concatenate([lstm_last, pooled], axis=1)
    return combined @ params["fc_w"].T + params["fc_b"]


# ------------------------------------ parameter init --------------------------------
def init_params(key, lstm_size, filter_sizes, kernel_sizes, num_layers):
    keys = iter(jax.random.split(key, 64))

    def rnd(shape, scale=0.1):
        return scale * jax.random.normal(next(keys), shape, jnp.float32)

    lstm_params = []
    d_in = 1
    for _ in range(num_layers):
        w_ih = rnd((4 * lstm_size, d_in))
        w_hh = rnd((4 * lstm_size, lstm_size))
        b = (rnd((4 * lstm_size,)) + rnd((4 * lstm_size,))).reshape(1, 4 * lstm_size)
        lstm_params.append((w_ih, w_hh, b))
        d_in = lstm_size

    convs = []
    c_in = 1
    eps = 1e-5
    for c_out, k in zip(filter_sizes, kernel_sizes):
        w = rnd((c_out, c_in, k))
        bias = rnd((c_out,))
        gamma = 1.0 + rnd((c_out,))
        beta = rnd((c_out,))
        running_mean = jnp.zeros((c_out,), jnp.float32)
        running_var = jnp.ones((c_out,), jnp.float32)
        scale = gamma / jnp.sqrt(running_var + eps)
        shift = beta + (bias - running_mean) * scale
        convs.append((w, scale.reshape(1, c_out), shift.reshape(1, c_out)))
        c_in = c_out

    fc_w = rnd((2, lstm_size + filter_sizes[-1]))
    fc_b = rnd((1, 2))
    return dict(lstm=lstm_params, convs=convs, fc_w=fc_w, fc_b=fc_b)


if __name__ == "__main__":
    B, T = 2, 16
    lstm_size = 32
    filter_sizes = (8, 16, 8)
    kernel_sizes = (5, 3, 3)
    num_layers = 1
    # dropout = 0.1  (identity at inference)

    key = jax.random.PRNGKey(0)
    kp, kx = jax.random.split(key)
    params = init_params(kp, lstm_size, filter_sizes, kernel_sizes, num_layers)
    prepped = prepare_params(params)            # one-time: transposes, padding, bf16 casts
    x = jax.random.normal(kx, (B, T, 1), jnp.float32)

    roll_like_jnp = probe_roll_like_jnp()       # one-time lane-rotation convention probe
    fwd = jax.jit(functools.partial(lstm_fcn_forward, roll_like_jnp=roll_like_jnp))
    out = jax.block_until_ready(fwd(x, prepped))
    assert out.shape == (B, 2), out.shape

    # Tolerance widened vs the pure-f32 reference because MXU operands are bf16
    # (state and elementwise math stay f32); observed error is O(1e-3), bound 3e-2.
    ref = reference_forward(x, params)
    if not jnp.allclose(out, ref, atol=3e-2, rtol=3e-2):
        raise AssertionError(f"mismatch vs reference:\n{out}\n{ref}")

    print("KERNEL_OK")
</pallas_src>

<mosaic_0001>
module attributes {stable_mosaic.version = 11 : i64} {
  func.func @_k(%arg0: memref<8x128xf32, #tpu.memory_space<vmem>>, %arg1: memref<8x128xf32, #tpu.memory_space<vmem>>) attributes {dimension_semantics = [], scalar_prefetch = 0 : i64, scratch_operands = 0 : i64, tpu.core_type = #tpu.core_type<tc>} {
    %c0 = arith.constant 0 : index
    %c0_0 = arith.constant 0 : index
    %0 = vector.load %arg0[%c0, %c0_0] : memref<8x128xf32, #tpu.memory_space<vmem>>, vector<8x128xf32>
    %c1_i32 = arith.constant 1 : i32
    %1 = tpu.dynamic_rotate %0 by %c1_i32 dim 1 : vector<8x128xf32>, i32 -> vector<8x128xf32>
    %c0_1 = arith.constant 0 : index
    %c0_2 = arith.constant 0 : index
    %2 = vector.load %arg1[%c0_1, %c0_2] : memref<8x128xf32, #tpu.memory_space<vmem>>, vector<8x128xf32>
    tpu.vector_store %arg1[%c0_1, %c0_2], %1 {strides = array<i32>} : memref<8x128xf32, #tpu.memory_space<vmem>>, vector<8x128xf32>,
    return
  }
}

</mosaic_0001>

<bundles_post_ra>
// kernel: tpu_custom_call.1
= control target key start
LH: loop header
LB: loop body
LE: loop exit
PB: predicated region body
PF: predicated region fallthrough
CT: control target
= control target key end

     0   :  { %6 = vsyncpa [#allocation3], 0  ;;  %s128_s0 = inlined_call_operand.hbm [shape: f32[8,128], index: 0, kind: input, shape index: {}]   ;;  %s129_s1 = inlined_call_operand.hbm [shape: f32[8,128], index: 1, kind: output, shape index: {}]  }
   0x1   :  { %7 = vsyncpa [#allocation4], 0  ;;  %s91_s6 = smov [#allocation2]   ;;  %s43_s10 = scalar_lea.hbm %s128_s0, 128 }
   0x2   :  { %s14_s7 = sshll.u32 %s91_s6, 4  ;;  %p44_p0 = scmp.ne.s32.totalorder %s128_s0, %s43_s10  ;;  %s15_s7 = int_to_ptr.vmem [resolvable:$true] %s14_s7 }
   0x3   :  { %p47_p1 = scmp.lt.u32.totalorder %s43_s10, %s128_s0 }
   0x5   :  { %p49_p2 = pnand %p47_p1, %p44_p0 }
   0x7   :  { %52 = shalt.err (!%p49_p2)
}
   0x8   :  { %s53_s15 = scalar_lea.vmem %s15_s7, 128  ;;  %p58_p4 = scmp.lt.s32.totalorder %s15_s7, %s15_s7 }
   0x9   :  { %p54_p3 = scmp.ne.s32.totalorder %s15_s7, %s53_s15  ;;  %p59_p5 = scmp.lt.s32.totalorder %s53_s15, %s53_s15 }
   0xb   :  { %p60_p6 = por %p59_p5, %p58_p4 }
   0xd   :  { %p61_p7 = pnand %p60_p6, %p54_p3 }
   0xf   :  { %64 = shalt.err (!%p61_p7)
}
  0x10   :  { %17 = dma.hbm_to_vmem [thread:$0]  %s128_s0, 128, %s15_s7, [#allocation3]  }
  0x11   :  { %87 = dma.done.wait [#allocation3], 128  }
  0x12   :  { %88 = vsyncadd [#allocation3], 4294967168  ;;  %v21_v0 = vld [vmem:[#allocation2] sm:$0xff]  ;;  %s92_s18 = smov 1   ;;  %s93_s19 = smov [#allocation5]  }
  0x13   :  { %22 = vrot.lane.b32.xlu0 %v21_v0, %s92_s18  ;;  %s31_s20 = sshll.u32 %s93_s19, 4  ;;  %s32_s20 = int_to_ptr.vmem [resolvable:$true] %s31_s20 }
  0x14   :  { %s65_s21 = scalar_lea.vmem %s32_s20, 128  ;;  %p70_p9 = scmp.lt.s32.totalorder %s32_s20, %s32_s20 }
  0x15   :  { %p66_p8 = scmp.ne.s32.totalorder %s32_s20, %s65_s21  ;;  %p71_p10 = scmp.lt.s32.totalorder %s65_s21, %s65_s21 }
  0x17   :  { %p72_p11 = por %p71_p10, %p70_p9 }
  0x19   :  { %p73_p12 = pnand %p72_p11, %p66_p8 }
  0x85   :  { %v23_v1 = vpop.permute.xlu0 %22 }
  0x86   :  { %24 = vst [vmem:[#allocation5] sm:$0xff] %v23_v1 }
  0x87   :  { %76 = shalt.err (!%p73_p12)
}
  0x88   :  { %s77_s0 = scalar_lea.hbm %s129_s1, 128 }
  0x89   :  { %p78_p13 = scmp.ne.s32.totalorder %s129_s1, %s77_s0  ;;  %p81_p0 = scmp.lt.u32.totalorder %s77_s0, %s129_s1 }
  0x8b   :  { %p83_p1 = pnand %p81_p0, %p78_p13 }
  0x8d   :  { %86 = shalt.err (!%p83_p1)
}
  0x8e   :  { %34 = dma.vmem_to_hbm [thread:$0]  %s32_s20, 128, %s129_s1, [#allocation4]  }
  0x8f   :  { %89 = dma.done.wait [#allocation4], 128  }
  0x90   :  { %90 = vsyncadd [#allocation4], 4294967168 }
  0x91   :  { %38 = vsyncpa [#allocation3], 1 }
  0x92   :  { %39 = vsyncpa [#allocation4], 1 }

</bundles_post_ra>
